<compile_context>
chip_gen: v5e
topology: v5e:2x2
jax: 0.10.0
libtpu: 0.0.40
codegen_flags: <defaults>
</compile_context>

<pallas_src>
import functools
import math

import jax
import jax.numpy as jnp
from jax.experimental import pallas as pl
from jax.experimental.pallas import tpu as pltpu


def _round_up(x: int, m: int) -> int:
    return (x + m - 1) // m * m


# --------------------------------------------------------------------------- #
# Fused kernel
# --------------------------------------------------------------------------- #
def _mlp_fused_kernel(x_ref, *args, num_layers: int):
    """Run one (tm, in_pad0) batch tile through the whole layer stack.

    args layout: w_0, b_0, w_1, b_1, ..., w_{L-1}, b_{L-1}, o_ref.
    w_i is already transposed to (in_pad_i, out_pad_i) and zero padded;
    b_i is (1, out_pad_i) float32.  The running activation is carried as a
    traced value (vregs / compiler-managed VMEM), never bounced through scratch.
    """
    o_ref = args[2 * num_layers]

    y = x_ref[...]                               # (tm, in_pad0)
    for i in range(num_layers):                  # static unroll: shapes are static
        w_ref = args[2 * i]
        b_ref = args[2 * i + 1]
        y = jnp.dot(y.astype(w_ref.dtype), w_ref[...],
                    preferred_element_type=jnp.float32)
        y = y + b_ref[...]                       # (1, out_pad) f32 lane-broadcast add
        if i < num_layers - 1:
            y = jnp.maximum(y, 0.0)
    o_ref[...] = y.astype(o_ref.dtype)


# --------------------------------------------------------------------------- #
# pallas_call wrapper (jitted)
# --------------------------------------------------------------------------- #
@functools.partial(
    jax.jit,
    static_argnames=("num_layers", "tm", "single_buffer_weights",
                     "vmem_limit_bytes"),
)
def _mlp_pallas(x_p, flat_params, *, num_layers, tm, single_buffer_weights,
                vmem_limit_bytes):
    m_pad, in_pad0 = x_p.shape
    out_pad_last = flat_params[-2].shape[1]

    # Constant index_map -> weights fetched once and stay resident in VMEM.
    def _const(i):
        return (0, 0)

    w_kwargs = dict(pipeline_mode=pl.Buffered(1)) if single_buffer_weights else {}

    in_specs = [pl.BlockSpec((tm, in_pad0), lambda i: (i, 0))]
    for li in range(num_layers):
        w_shape = flat_params[2 * li].shape
        b_shape = flat_params[2 * li + 1].shape
        in_specs.append(pl.BlockSpec(w_shape, _const, **w_kwargs))
        in_specs.append(pl.BlockSpec(b_shape, _const, **w_kwargs))

    return pl.pallas_call(
        functools.partial(_mlp_fused_kernel, num_layers=num_layers),
        out_shape=jax.ShapeDtypeStruct((m_pad, out_pad_last), x_p.dtype),
        grid=(m_pad // tm,),
        in_specs=in_specs,
        out_specs=pl.BlockSpec((tm, out_pad_last), lambda i: (i, 0)),
        compiler_params=pltpu.CompilerParams(
            dimension_semantics=("parallel",),     # shard batch tiles across TCs
            vmem_limit_bytes=vmem_limit_bytes,
        ),
    )(x_p, *flat_params)


# --------------------------------------------------------------------------- #
# Forward wrapper
# --------------------------------------------------------------------------- #
_SINGLE_BUFFER_OK = None   # cached capability check for pl.Buffered(1)


def _choose_tm(M: int, sublane: int) -> int:
    m_ceil = _round_up(max(M, 1), sublane)
    if m_ceil <= sublane:
        return m_ceil
    tm = min(512, m_ceil)
    # Ensure >= 2 grid steps when the batch allows it so the "parallel" axis
    # can actually use both TensorCores on v7x.
    if m_ceil // tm < 2:
        tm = _round_up(pl.cdiv(m_ceil, 2), sublane)
    return tm


def mlp_forward(x, prepared_params, *, out_dim, tm=None):
    """Equivalent of MLP.forward.  `prepared_params` comes from prepare_params."""
    global _SINGLE_BUFFER_OK

    orig_shape = x.shape
    K = orig_shape[-1]
    x2 = x.reshape(-1, K)
    M = x2.shape[0]

    num_layers = len(prepared_params)
    in_pad0 = prepared_params[0][0].shape[0]
    out_pad_last = prepared_params[-1][0].shape[1]
    assert K <= in_pad0, "input feature dim larger than prepared weights"

    # 16-row granularity for sub-32-bit inputs (bf16 packs (16,128) per vreg).
    sublane = 8 if x.dtype.itemsize >= 4 else 16
    if tm is None:
        tm_eff = _choose_tm(M, sublane)
    else:
        tm_eff = max(sublane,
                     _round_up(min(tm, _round_up(max(M, 1), sublane)), sublane))
    m_pad = _round_up(max(M, 1), tm_eff)

    # Zero-pad rows to the tile grid and features to the first layer's padded
    # input width only.  Zero padding is exact for Linear(+ReLU) stacks.
    x_p = jnp.zeros((m_pad, in_pad0), x.dtype).at[:M, :K].set(x2)

    flat = []
    for w, b in prepared_params:
        flat.extend((w, b))
    flat = tuple(flat)

    # ---- VMEM budget computed from actual buffer sizes --------------------
    weight_bytes = sum(int(a.size) * a.dtype.itemsize for a in flat)
    if weight_bytes > (56 << 20):
        # TODO(synk): add a K/N-tiled weight-streaming path (grid axis over the
        # hidden dim with pl.when-accumulate / pltpu.emit_pipeline) for stacks
        # that do not fit resident in VMEM (v7x has only 64 MiB per TensorCore).
        raise ValueError(
            f"MLP weight stack ({weight_bytes / 2**20:.1f} MiB) exceeds the "
            "resident-VMEM budget of this fused kernel.")

    io_bytes = 2 * tm_eff * (in_pad0 + out_pad_last) * x.dtype.itemsize
    max_pad = max([in_pad0] + [w.shape[1] for w, _ in prepared_params])
    work_bytes = 2 * tm_eff * max_pad * 4          # live f32 activation bound
    needed = 2 * weight_bytes + io_bytes + work_bytes   # worst case 2x weights
    try:
        phys = int(pltpu.get_tpu_info().vmem_capacity_bytes)
    except Exception:
        phys = 64 << 20                            # conservative (v7x per-TC)
    vmem_limit = int(min(max(needed + (4 << 20), 32 << 20), int(phys * 0.9)))

    call = functools.partial(
        _mlp_pallas, x_p, flat,
        num_layers=num_layers, tm=tm_eff, vmem_limit_bytes=vmem_limit)

    out = None
    if _SINGLE_BUFFER_OK is not False:
        try:
            out = call(single_buffer_weights=True)
            _SINGLE_BUFFER_OK = True
        except Exception:
            _SINGLE_BUFFER_OK = False      # Buffered(1) unsupported -> default 2x
    if out is None:
        out = call(single_buffer_weights=False)

    out = out[:M, :out_dim]
    return out.reshape(*orig_shape[:-1], out_dim)


# --------------------------------------------------------------------------- #
# Parameter init / one-time layout preparation
# --------------------------------------------------------------------------- #
def init_mlp_params(key, input_dim, hidden_dim, output_dim, num_layers,
                    dtype=jnp.float32):
    """Deterministic init matching torch.nn.Linear's U(-1/sqrt(fan_in), ...) scheme.
    Weights stored PyTorch-style as (out_features, in_features)."""
    h = [hidden_dim] * (num_layers - 1)
    dims = list(zip([input_dim] + h, h + [output_dim]))
    params = []
    for (n_in, n_out) in dims:
        key, kw, kb = jax.random.split(key, 3)
        bound = 1.0 / math.sqrt(n_in)
        w = jax.random.uniform(kw, (n_out, n_in), dtype, -bound, bound)
        b = jax.random.uniform(kb, (n_out,), dtype, -bound, bound)
        params.append((w, b))
    return params


def prepare_params(params, *, param_dtype=jnp.bfloat16, lane=128):
    """One-time layout prep.

    Transposes each PyTorch-style (out, in) weight to (in, out), casts to
    `param_dtype` (bf16 default: MXU-native, halves weight HBM/VMEM), and
    zero-pads each layer to its own lane-dense shape
    (round_up(in,128), round_up(out,128)).  Biases stay f32, shape (1, out_pad).
    """
    dims = [params[0][0].shape[1]] + [w.shape[0] for (w, _) in params]
    dims_pad = [_round_up(d, lane) for d in dims]
    prepared = []
    for li, (w, b) in enumerate(params):
        n_out, n_in = w.shape
        p_in, p_out = dims_pad[li], dims_pad[li + 1]
        w_t = (jnp.zeros((p_in, p_out), param_dtype)
               .at[:n_in, :n_out].set(w.T.astype(param_dtype)))
        b_p = (jnp.zeros((1, p_out), jnp.float32)
               .at[0, :n_out].set(b.astype(jnp.float32)))
        prepared.append((w_t, b_p))
    return prepared


def mlp_reference(x, params):
    """Pure-JAX reference (unpadded, per-layer) for correctness checking."""
    num_layers = len(params)
    for i, (w, b) in enumerate(params):
        x = x @ w.T + b
        if i < num_layers - 1:
            x = jnp.maximum(x, 0.0)
    return x


# --------------------------------------------------------------------------- #
# Self-test
# --------------------------------------------------------------------------- #
if __name__ == "__main__":
    # MLP(input_dim=32, hidden_dim=64, output_dim=16, num_layers=3), batch of 8.
    input_dim, hidden_dim, output_dim, num_layers = 32, 64, 16, 3
    batch = 8

    key = jax.random.PRNGKey(0)
    k_x, k_p = jax.random.split(key)
    x = jax.random.normal(k_x, (batch, input_dim), jnp.float32)
    params = init_mlp_params(k_p, input_dim, hidden_dim, output_dim, num_layers)
    ref = mlp_reference(x, params)

    # f32 weights: bit-accurate path.
    prepared_f32 = prepare_params(params, param_dtype=jnp.float32)
    out_f32 = jax.block_until_ready(mlp_forward(x, prepared_f32, out_dim=output_dim))
    assert out_f32.shape == (batch, output_dim), out_f32.shape
    assert jnp.allclose(out_f32, ref, atol=1e-5, rtol=1e-5), "f32 mismatch vs reference"

    # bf16 weights (default, MXU-native): looser tolerance.
    prepared_bf16 = prepare_params(params)
    out_bf16 = jax.block_until_ready(mlp_forward(x, prepared_bf16, out_dim=output_dim))
    assert out_bf16.shape == (batch, output_dim), out_bf16.shape
    assert jnp.allclose(out_bf16, ref, atol=3e-2, rtol=3e-2), "bf16 mismatch vs reference"

    # Odd row count + 3-D input (exercises row padding and leading-dim flatten).
    x3 = jax.random.normal(jax.random.PRNGKey(1), (2, 5, input_dim), jnp.float32)
    out3 = jax.block_until_ready(mlp_forward(x3, prepared_f32, out_dim=output_dim))
    ref3 = mlp_reference(x3.reshape(-1, input_dim), params).reshape(2, 5, output_dim)
    assert out3.shape == (2, 5, output_dim), out3.shape
    assert jnp.allclose(out3, ref3, atol=1e-5, rtol=1e-5), "3-D input mismatch"

    # Larger batch -> >=2 grid steps (exercises the parallel batch grid axis).
    x_big = jax.random.normal(jax.random.PRNGKey(2), (24, input_dim), jnp.float32)
    out_big = jax.block_until_ready(mlp_forward(x_big, prepared_f32, out_dim=output_dim))
    ref_big = mlp_reference(x_big, params)
    assert out_big.shape == (24, output_dim), out_big.shape
    assert jnp.allclose(out_big, ref_big, atol=1e-5, rtol=1e-5), "grid>1 mismatch"

    print("KERNEL_OK")
</pallas_src>

<mosaic_0001>
module attributes {stable_mosaic.version = 11 : i64} {
  func.func @_mlp_fused_kernel(%arg0: i32, %arg1: memref<8x128xf32, #tpu.memory_space<vmem>>, %arg2: memref<128x128xf32, #tpu.memory_space<vmem>>, %arg3: memref<1x128xf32, #tpu.memory_space<vmem>>, %arg4: memref<128x128xf32, #tpu.memory_space<vmem>>, %arg5: memref<1x128xf32, #tpu.memory_space<vmem>>, %arg6: memref<128x128xf32, #tpu.memory_space<vmem>>, %arg7: memref<1x128xf32, #tpu.memory_space<vmem>>, %arg8: memref<8x128xf32, #tpu.memory_space<vmem>>) attributes {dimension_semantics = [#tpu.dimension_semantics<parallel>], iteration_bounds = array<i64: 1>, scalar_prefetch = 0 : i64, scratch_operands = 0 : i64, tpu.core_type = #tpu.core_type<tc>, window_params = [{transform_indices = @transform_0, window_bounds = array<i64: 8, 128>}, {pipeline_mode = #tpu.pipeline_mode<synchronous>, transform_indices = @transform_1, window_bounds = array<i64: 128, 128>}, {pipeline_mode = #tpu.pipeline_mode<synchronous>, transform_indices = @transform_2, window_bounds = array<i64: 1, 128>}, {pipeline_mode = #tpu.pipeline_mode<synchronous>, transform_indices = @transform_3, window_bounds = array<i64: 128, 128>}, {pipeline_mode = #tpu.pipeline_mode<synchronous>, transform_indices = @transform_4, window_bounds = array<i64: 1, 128>}, {pipeline_mode = #tpu.pipeline_mode<synchronous>, transform_indices = @transform_5, window_bounds = array<i64: 128, 128>}, {pipeline_mode = #tpu.pipeline_mode<synchronous>, transform_indices = @transform_6, window_bounds = array<i64: 1, 128>}, {transform_indices = @transform_7, window_bounds = array<i64: 8, 128>}]} {
    %c0 = arith.constant 0 : index
    %c0_0 = arith.constant 0 : index
    %0 = vector.load %arg1[%c0, %c0_0] : memref<8x128xf32, #tpu.memory_space<vmem>>, vector<8x128xf32>
    %c0_1 = arith.constant 0 : index
    %c0_2 = arith.constant 0 : index
    %1 = vector.load %arg2[%c0_1, %c0_2] : memref<128x128xf32, #tpu.memory_space<vmem>>, vector<128x128xf32>
    %cst = arith.constant dense<0.000000e+00> : vector<8x128xf32>
    %2 = tpu.matmul %0, %1, %cst {dimension_numbers = #tpu.dot_dimension_numbers<[1], [0], [0], [1], [0, 0, 1, 1], [], []>} : vector<8x128xf32>, vector<128x128xf32>, vector<8x128xf32> -> vector<8x128xf32>
    %c0_3 = arith.constant 0 : index
    %c0_4 = arith.constant 0 : index
    %3 = vector.load %arg3[%c0_3, %c0_4] : memref<1x128xf32, #tpu.memory_space<vmem>>, vector<1x128xf32>
    %4 = vector.broadcast %3 : vector<1x128xf32> to vector<8x128xf32>
    %5 = arith.addf %2, %4 : vector<8x128xf32>
    %cst_5 = arith.constant 0.000000e+00 : f32
    %6 = vector.broadcast %cst_5 : f32 to vector<8x128xf32>
    %7 = arith.maximumf %5, %6 : vector<8x128xf32>
    %c0_6 = arith.constant 0 : index
    %c0_7 = arith.constant 0 : index
    %8 = vector.load %arg4[%c0_6, %c0_7] : memref<128x128xf32, #tpu.memory_space<vmem>>, vector<128x128xf32>
    %cst_8 = arith.constant dense<0.000000e+00> : vector<8x128xf32>
    %9 = tpu.matmul %7, %8, %cst_8 {dimension_numbers = #tpu.dot_dimension_numbers<[1], [0], [0], [1], [0, 0, 1, 1], [], []>} : vector<8x128xf32>, vector<128x128xf32>, vector<8x128xf32> -> vector<8x128xf32>
    %c0_9 = arith.constant 0 : index
    %c0_10 = arith.constant 0 : index
    %10 = vector.load %arg5[%c0_9, %c0_10] : memref<1x128xf32, #tpu.memory_space<vmem>>, vector<1x128xf32>
    %11 = vector.broadcast %10 : vector<1x128xf32> to vector<8x128xf32>
    %12 = arith.addf %9, %11 : vector<8x128xf32>
    %cst_11 = arith.constant 0.000000e+00 : f32
    %13 = vector.broadcast %cst_11 : f32 to vector<8x128xf32>
    %14 = arith.maximumf %12, %13 : vector<8x128xf32>
    %c0_12 = arith.constant 0 : index
    %c0_13 = arith.constant 0 : index
    %15 = vector.load %arg6[%c0_12, %c0_13] : memref<128x128xf32, #tpu.memory_space<vmem>>, vector<128x128xf32>
    %cst_14 = arith.constant dense<0.000000e+00> : vector<8x128xf32>
    %16 = tpu.matmul %14, %15, %cst_14 {dimension_numbers = #tpu.dot_dimension_numbers<[1], [0], [0], [1], [0, 0, 1, 1], [], []>} : vector<8x128xf32>, vector<128x128xf32>, vector<8x128xf32> -> vector<8x128xf32>
    %c0_15 = arith.constant 0 : index
    %c0_16 = arith.constant 0 : index
    %17 = vector.load %arg7[%c0_15, %c0_16] : memref<1x128xf32, #tpu.memory_space<vmem>>, vector<1x128xf32>
    %18 = vector.broadcast %17 : vector<1x128xf32> to vector<8x128xf32>
    %19 = arith.addf %16, %18 : vector<8x128xf32>
    %c0_17 = arith.constant 0 : index
    %c0_18 = arith.constant 0 : index
    %20 = vector.load %arg8[%c0_17, %c0_18] : memref<8x128xf32, #tpu.memory_space<vmem>>, vector<8x128xf32>
    tpu.vector_store %arg8[%c0_17, %c0_18], %19 {strides = array<i32>} : memref<8x128xf32, #tpu.memory_space<vmem>>, vector<8x128xf32>,
    return
  }
  func.func @transform_0(%arg0: i32) -> (i32, i32) {
    %c0_i32 = arith.constant 0 : i32
    %c0_i32_0 = arith.constant 0 : i32
    return %arg0, %c0_i32 : i32, i32
  }
  func.func @transform_1(%arg0: i32) -> (i32, i32) {
    %c0_i32 = arith.constant 0 : i32
    %c0_i32_0 = arith.constant 0 : i32
    %c0_i32_1 = arith.constant 0 : i32
    return %c0_i32, %c0_i32_0 : i32, i32
  }
  func.func @transform_2(%arg0: i32) -> (i32, i32) {
    %c0_i32 = arith.constant 0 : i32
    %c0_i32_0 = arith.constant 0 : i32
    %c0_i32_1 = arith.constant 0 : i32
    return %c0_i32, %c0_i32_0 : i32, i32
  }
  func.func @transform_3(%arg0: i32) -> (i32, i32) {
    %c0_i32 = arith.constant 0 : i32
    %c0_i32_0 = arith.constant 0 : i32
    %c0_i32_1 = arith.constant 0 : i32
    return %c0_i32, %c0_i32_0 : i32, i32
  }
  func.func @transform_4(%arg0: i32) -> (i32, i32) {
    %c0_i32 = arith.constant 0 : i32
    %c0_i32_0 = arith.constant 0 : i32
    %c0_i32_1 = arith.constant 0 : i32
    return %c0_i32, %c0_i32_0 : i32, i32
  }
  func.func @transform_5(%arg0: i32) -> (i32, i32) {
    %c0_i32 = arith.constant 0 : i32
    %c0_i32_0 = arith.constant 0 : i32
    %c0_i32_1 = arith.constant 0 : i32
    return %c0_i32, %c0_i32_0 : i32, i32
  }
  func.func @transform_6(%arg0: i32) -> (i32, i32) {
    %c0_i32 = arith.constant 0 : i32
    %c0_i32_0 = arith.constant 0 : i32
    %c0_i32_1 = arith.constant 0 : i32
    return %c0_i32, %c0_i32_0 : i32, i32
  }
  func.func @transform_7(%arg0: i32) -> (i32, i32) {
    %c0_i32 = arith.constant 0 : i32
    %c0_i32_0 = arith.constant 0 : i32
    return %arg0, %c0_i32 : i32, i32
  }
}

module attributes {stable_mosaic.version = 11 : i64} {
  func.func @_mlp_fused_kernel(%arg0: i32, %arg1: memref<8x128xf32, #tpu.memory_space<vmem>>, %arg2: memref<128x128xf32, #tpu.memory_space<vmem>>, %arg3: memref<1x128xf32, #tpu.memory_space<vmem>>, %arg4: memref<128x128xf32, #tpu.memory_space<vmem>>, %arg5: memref<1x128xf32, #tpu.memory_space<vmem>>, %arg6: memref<128x128xf32, #tpu.memory_space<vmem>>, %arg7: memref<1x128xf32, #tpu.memory_space<vmem>>, %arg8: memref<8x128xf32, #tpu.memory_space<vmem>>) attributes {dimension_semantics = [#tpu.dimension_semantics<parallel>], iteration_bounds = array<i64: 1>, scalar_prefetch = 0 : i64, scratch_operands = 0 : i64, tpu.core_type = #tpu.core_type<tc>, window_params = [{transform_indices = @transform_0, window_bounds = array<i64: 8, 128>}, {pipeline_mode = #tpu.pipeline_mode<synchronous>, transform_indices = @transform_1, window_bounds = array<i64: 128, 128>}, {pipeline_mode = #tpu.pipeline_mode<synchronous>, transform_indices = @transform_2, window_bounds = array<i64: 1, 128>}, {pipeline_mode = #tpu.pipeline_mode<synchronous>, transform_indices = @transform_3, window_bounds = array<i64: 128, 128>}, {pipeline_mode = #tpu.pipeline_mode<synchronous>, transform_indices = @transform_4, window_bounds = array<i64: 1, 128>}, {pipeline_mode = #tpu.pipeline_mode<synchronous>, transform_indices = @transform_5, window_bounds = array<i64: 128, 128>}, {pipeline_mode = #tpu.pipeline_mode<synchronous>, transform_indices = @transform_6, window_bounds = array<i64: 1, 128>}, {transform_indices = @transform_7, window_bounds = array<i64: 8, 128>}]} {
    %c0 = arith.constant 0 : index
    %c0_0 = arith.constant 0 : index
    %0 = vector.load %arg1[%c0, %c0_0] : memref<8x128xf32, #tpu.memory_space<vmem>>, vector<8x128xf32>
    %c0_1 = arith.constant 0 : index
    %c0_2 = arith.constant 0 : index
    %1 = vector.load %arg2[%c0_1, %c0_2] : memref<128x128xf32, #tpu.memory_space<vmem>>, vector<128x128xf32>
    %cst = arith.constant dense<0.000000e+00> : vector<8x128xf32>
    %2 = tpu.matmul %0, %1, %cst {dimension_numbers = #tpu.dot_dimension_numbers<[1], [0], [0], [1], [0, 0, 1, 1], [], []>} : vector<8x128xf32>, vector<128x128xf32>, vector<8x128xf32> -> vector<8x128xf32>
    %c0_3 = arith.constant 0 : index
    %c0_4 = arith.constant 0 : index
    %3 = vector.load %arg3[%c0_3, %c0_4] : memref<1x128xf32, #tpu.memory_space<vmem>>, vector<1x128xf32>
    %4 = vector.broadcast %3 : vector<1x128xf32> to vector<8x128xf32>
    %5 = arith.addf %2, %4 : vector<8x128xf32>
    %cst_5 = arith.constant 0.000000e+00 : f32
    %6 = vector.broadcast %cst_5 : f32 to vector<8x128xf32>
    %7 = arith.maximumf %5, %6 : vector<8x128xf32>
    %c0_6 = arith.constant 0 : index
    %c0_7 = arith.constant 0 : index
    %8 = vector.load %arg4[%c0_6, %c0_7] : memref<128x128xf32, #tpu.memory_space<vmem>>, vector<128x128xf32>
    %cst_8 = arith.constant dense<0.000000e+00> : vector<8x128xf32>
    %9 = tpu.matmul %7, %8, %cst_8 {dimension_numbers = #tpu.dot_dimension_numbers<[1], [0], [0], [1], [0, 0, 1, 1], [], []>} : vector<8x128xf32>, vector<128x128xf32>, vector<8x128xf32> -> vector<8x128xf32>
    %c0_9 = arith.constant 0 : index
    %c0_10 = arith.constant 0 : index
    %10 = vector.load %arg5[%c0_9, %c0_10] : memref<1x128xf32, #tpu.memory_space<vmem>>, vector<1x128xf32>
    %11 = vector.broadcast %10 : vector<1x128xf32> to vector<8x128xf32>
    %12 = arith.addf %9, %11 : vector<8x128xf32>
    %cst_11 = arith.constant 0.000000e+00 : f32
    %13 = vector.broadcast %cst_11 : f32 to vector<8x128xf32>
    %14 = arith.maximumf %12, %13 : vector<8x128xf32>
    %c0_12 = arith.constant 0 : index
    %c0_13 = arith.constant 0 : index
    %15 = vector.load %arg6[%c0_12, %c0_13] : memref<128x128xf32, #tpu.memory_space<vmem>>, vector<128x128xf32>
    %cst_14 = arith.constant dense<0.000000e+00> : vector<8x128xf32>
    %16 = tpu.matmul %14, %15, %cst_14 {dimension_numbers = #tpu.dot_dimension_numbers<[1], [0], [0], [1], [0, 0, 1, 1], [], []>} : vector<8x128xf32>, vector<128x128xf32>, vector<8x128xf32> -> vector<8x128xf32>
    %c0_15 = arith.constant 0 : index
    %c0_16 = arith.constant 0 : index
    %17 = vector.load %arg7[%c0_15, %c0_16] : memref<1x128xf32, #tpu.memory_space<vmem>>, vector<1x128xf32>
    %18 = vector.broadcast %17 : vector<1x128xf32> to vector<8x128xf32>
    %19 = arith.addf %16, %18 : vector<8x128xf32>
    %c0_17 = arith.constant 0 : index
    %c0_18 = arith.constant 0 : index
    %20 = vector.load %arg8[%c0_17, %c0_18] : memref<8x128xf32, #tpu.memory_space<vmem>>, vector<8x128xf32>
    tpu.vector_store %arg8[%c0_17, %c0_18], %19 {strides = array<i32>} : memref<8x128xf32, #tpu.memory_space<vmem>>, vector<8x128xf32>,
    return
  }
  func.func @transform_0(%arg0: i32) -> (i32, i32) {
    %c0_i32 = arith.constant 0 : i32
    %c0_i32_0 = arith.constant 0 : i32
    return %arg0, %c0_i32 : i32, i32
  }
  func.func @transform_1(%arg0: i32) -> (i32, i32) {
    %c0_i32 = arith.constant 0 : i32
    %c0_i32_0 = arith.constant 0 : i32
    %c0_i32_1 = arith.constant 0 : i32
    return %c0_i32, %c0_i32_0 : i32, i32
  }
  func.func @transform_2(%arg0: i32) -> (i32, i32) {
    %c0_i32 = arith.constant 0 : i32
    %c0_i32_0 = arith.constant 0 : i32
    %c0_i32_1 = arith.constant 0 : i32
    return %c0_i32, %c0_i32_0 : i32, i32
  }
  func.func @transform_3(%arg0: i32) -> (i32, i32) {
    %c0_i32 = arith.constant 0 : i32
    %c0_i32_0 = arith.constant 0 : i32
    %c0_i32_1 = arith.constant 0 : i32
    return %c0_i32, %c0_i32_0 : i32, i32
  }
  func.func @transform_4(%arg0: i32) -> (i32, i32) {
    %c0_i32 = arith.constant 0 : i32
    %c0_i32_0 = arith.constant 0 : i32
    %c0_i32_1 = arith.constant 0 : i32
    return %c0_i32, %c0_i32_0 : i32, i32
  }
  func.func @transform_5(%arg0: i32) -> (i32, i32) {
    %c0_i32 = arith.constant 0 : i32
    %c0_i32_0 = arith.constant 0 : i32
    %c0_i32_1 = arith.constant 0 : i32
    return %c0_i32, %c0_i32_0 : i32, i32
  }
  func.func @transform_6(%arg0: i32) -> (i32, i32) {
    %c0_i32 = arith.constant 0 : i32
    %c0_i32_0 = arith.constant 0 : i32
    %c0_i32_1 = arith.constant 0 : i32
    return %c0_i32, %c0_i32_0 : i32, i32
  }
  func.func @transform_7(%arg0: i32) -> (i32, i32) {
    %c0_i32 = arith.constant 0 : i32
    %c0_i32_0 = arith.constant 0 : i32
    return %arg0, %c0_i32 : i32, i32
  }
}

</mosaic_0001>

<bundles_post_ra>
// kernel: _mlp_pallas.1
= control target key start
LH: loop header
LB: loop body
LE: loop exit
PB: predicated region body
PF: predicated region fallthrough
CT: control target
= control target key end

     0   :  { %12 = vsyncpa [#allocation3], 0  ;;  %s440_s0 = inlined_call_operand.hbm [shape: f32[8,128], index: 0, kind: input, shape index: {}]   ;;  %s441_s1 = inlined_call_operand.hbm [shape: f32[128,128], index: 1, kind: input, shape index: {}]   ;;  %s442_s2 = inlined_call_operand.vmem [shape: f32[1,128], index: 2, kind: input, shape index: {}]   ;;  %s443_s3 = inlined_call_operand.hbm [shape: f32[128,128], index: 3, kind: input, shape index: {}]   ;;  %s444_s4 = inlined_call_operand.vmem [shape: f32[1,128], index: 4, kind: input, shape index: {}]   ;;  %s445_s5 = inlined_call_operand.hbm [shape: f32[128,128], index: 5, kind: input, shape index: {}]   ;;  %s446_s6 = inlined_call_operand.vmem [shape: f32[1,128], index: 6, kind: input, shape index: {}]   ;;  %s447_s7 = inlined_call_operand.hbm [shape: f32[8,128], index: 7, kind: output, shape index: {}]  }
   0x1   :  { %13 = vsyncpa [#allocation6], 0 }
   0x2   :  { %14 = vsyncpa [#allocation9], 0  ;;  %s31_s26 = sshll.u32 %s441_s1, 4  ;;  %s32_s26 = int_to_ptr.hbm [resolvable:$true] %s31_s26 }
   0x3   :  { %15 = vsyncpa [#allocation4], 0  ;;  %s369_s27 = smov [#allocation5]   ;;  %s21_s8 = sshll.u32 %s440_s0, 4  ;;  %s22_s8 = int_to_ptr.hbm [resolvable:$true] %s21_s8 }
   0x4   :  { %s33_s28 = sshll.u32 %s369_s27, 4  ;;  %s370_s9 = smov 128   ;;  %s34_s28 = int_to_ptr.vmem [resolvable:$true] %s33_s28 }
   0x5   :  { %s371_s10 = smov 8   ;;  %s372_s11 = smov [#allocation2]  }
   0x6   :  { %39 = dma.hbm_to_vmem [thread:$0]  %s32_s26, 2048, %s34_s28, [#allocation6], %s370_s9, %s370_s9, %s371_s10  }
   0x7   :  { %s23_s12 = sshll.u32 %s372_s11, 4  ;;  %s46_s15 = sshll.u32 %s443_s3, 4  ;;  %s24_s12 = int_to_ptr.vmem [resolvable:$true] %s23_s12  ;;  %s47_s15 = int_to_ptr.hbm [resolvable:$true] %s46_s15 }
   0x8   :  { %26 = dma.hbm_to_vmem [thread:$0]  %s22_s8, 128, %s24_s12, [#allocation3]  }
   0x9   :  { %s61_s17 = sshll.u32 %s445_s5, 4  ;;  %s373_s18 = smov [#allocation7]   ;;  %s62_s17 = int_to_ptr.hbm [resolvable:$true] %s61_s17 }
   0xa   :  { %s48_s19 = sshll.u32 %s373_s18, 4  ;;  %s374_s0 = smov [#allocation8]   ;;  %s49_s19 = int_to_ptr.vmem [resolvable:$true] %s48_s19 }
   0xb   :  { %54 = dma.hbm_to_vmem [thread:$0]  %s47_s15, 2048, %s49_s19, [#allocation6], %s370_s9, %s370_s9, %s371_s10  }
   0xc   :  { %s63_s20 = sshll.u32 %s374_s0, 4  ;;  %s64_s20 = int_to_ptr.vmem [resolvable:$true] %s63_s20 }
   0xd   :  { %69 = dma.hbm_to_vmem [thread:$0]  %s62_s17, 2048, %s64_s20, [#allocation9], %s370_s9, %s370_s9, %s371_s10  }
   0xe   :  { %361 = dma.done.wait [#allocation3], 128  }
   0xf   :  { %362 = vsyncadd [#allocation3], 4294967168 }
  0x10   :  { %363 = dma.done.wait [#allocation6], 4096  }
  0x11   :  { %364 = vsyncadd [#allocation6], 4294963200 }
  0x12   :  { %365 = dma.done.wait [#allocation9], 2048  }
  0x13   :  { %366 = vsyncadd [#allocation9], 4294965248  ;;  %v104_v0 = vld [vmem:[#allocation5 + $0x78] sm:$0xff]  ;;  %v103_v1 = vld [vmem:[#allocation5 + $0x70] sm:$0xff]  ;;  %s375_s24 = smov [#allocation10]   ;;  %s219_s28 = sshll.u32 %s447_s7, 4  ;;  %s220_s28 = int_to_ptr.hbm [resolvable:$true] %s219_s28 }
  0x14   :  { %109 = vmatpush.msra.mxu0 %v104_v0  ;;  %v102_v2 = vld [vmem:[#allocation5 + $0x68] sm:$0xff]  ;;  %v101_v3 = vld [vmem:[#allocation5 + $0x60] sm:$0xff]  ;;  %v145_v4 = vld [vmem:[#allocation7 + $0x78] sm:$0xff]  ;;  %s217_s25 = sshll.u32 %s375_s24, 4  ;;  %s218_s25 = int_to_ptr.vmem [resolvable:$true] %s217_s25 }
  0x15   :  { %v100_v5 = vld [vmem:[#allocation5 + $0x58] sm:$0xff]  ;;  %150 = vmatpush.msra.mxu1 %v145_v4  ;;  %v144_v6 = vld [vmem:[#allocation7 + $0x70] sm:$0xff]  ;;  %v143_v7 = vld [vmem:[#allocation7 + $0x68] sm:$0xff] }
  0x16   :  { %110 = vmatpush.msra.mxu0 %v103_v1  ;;  %v99_v8 = vld [vmem:[#allocation5 + $0x50] sm:$0xff]  ;;  %v142_v9 = vld [vmem:[#allocation7 + $0x60] sm:$0xff]  ;;  %v98_v10 = vld [vmem:[#allocation5 + $0x48] sm:$0xff] }
  0x17   :  { %151 = vmatpush.msra.mxu1 %v144_v6  ;;  %v141_v11 = vld [vmem:[#allocation7 + $0x58] sm:$0xff]  ;;  %v97_v12 = vld [vmem:[#allocation5 + $0x40] sm:$0xff]  ;;  %v140_v13 = vld [vmem:[#allocation7 + $0x50] sm:$0xff] }
  0x18   :  { %111 = vmatpush.msra.mxu0 %v102_v2  ;;  %v96_v14 = vld [vmem:[#allocation5 + $0x38] sm:$0xff]  ;;  %v139_v15 = vld [vmem:[#allocation7 + $0x48] sm:$0xff]  ;;  %v95_v16 = vld [vmem:[#allocation5 + $0x30] sm:$0xff] }
  0x19   :  { %152 = vmatpush.msra.mxu1 %v143_v7  ;;  %v138_v17 = vld [vmem:[#allocation7 + $0x40] sm:$0xff]  ;;  %v94_v18 = vld [vmem:[#allocation5 + $0x28] sm:$0xff]  ;;  %v137_v19 = vld [vmem:[#allocation7 + $0x38] sm:$0xff] }
  0x1a   :  { %112 = vmatpush.msra.mxu0 %v101_v3  ;;  %v93_v20 = vld [vmem:[#allocation5 + $0x20] sm:$0xff]  ;;  %v136_v21 = vld [vmem:[#allocation7 + $0x30] sm:$0xff]  ;;  %v92_v22 = vld [vmem:[#allocation5 + $0x18] sm:$0xff] }
  0x1b   :  { %153 = vmatpush.msra.mxu1 %v142_v9  ;;  %v135_v23 = vld [vmem:[#allocation7 + $0x28] sm:$0xff]  ;;  %v91_v24 = vld [vmem:[#allocation5 + $0x10] sm:$0xff]  ;;  %v134_v25 = vld [vmem:[#allocation7 + $0x20] sm:$0xff] }
  0x1c   :  { %113 = vmatpush.msra.mxu0 %v100_v5  ;;  %v90_v26 = vld [vmem:[#allocation5 + $0x8] sm:$0xff]  ;;  %v133_v27 = vld [vmem:[#allocation7 + $0x18] sm:$0xff]  ;;  %v89_v28 = vld [vmem:[#allocation5] sm:$0xff] }
  0x1d   :  { %154 = vmatpush.msra.mxu1 %v141_v11  ;;  %v88_v29 = vld [vmem:[#allocation2] sm:$0xff]  ;;  %v132_v30 = vld [vmem:[#allocation7 + $0x10] sm:$0xff]  ;;  %v131_v31 = vld [vmem:[#allocation7 + $0x8] sm:$0xff] }
  0x1e   :  { %114 = vmatpush.msra.mxu0 %v99_v8  ;;  %v130_v32 = vld [vmem:[#allocation7] sm:$0xff]  ;;  %v186_v33 = vld [vmem:[#allocation8 + $0x78] sm:$0xff]  ;;  %v185_v34 = vld [vmem:[#allocation8 + $0x70] sm:$0xff] }
  0x1f   :  { %155 = vmatpush.msra.mxu1 %v140_v13  ;;  %191 = vmatpush.msra.mxu2 %v186_v33  ;;  %v184_v35 = vld [vmem:[#allocation8 + $0x68] sm:$0xff]  ;;  %v183_v36 = vld [vmem:[#allocation8 + $0x60] sm:$0xff]  ;;  %v182_v37 = vld [vmem:[#allocation8 + $0x58] sm:$0xff] }
  0x20   :  { %115 = vmatpush.msra.mxu0 %v98_v10  ;;  %v181_v38 = vld [vmem:[#allocation8 + $0x50] sm:$0xff]  ;;  %v180_v39 = vld [vmem:[#allocation8 + $0x48] sm:$0xff]  ;;  %v179_v40 = vld [vmem:[#allocation8 + $0x40] sm:$0xff] }
  0x21   :  { %156 = vmatpush.msra.mxu1 %v139_v15  ;;  %192 = vmatpush.msra.mxu2 %v185_v34  ;;  %v178_v41 = vld [vmem:[#allocation8 + $0x38] sm:$0xff]  ;;  %v177_v42 = vld [vmem:[#allocation8 + $0x30] sm:$0xff]  ;;  %v176_v43 = vld [vmem:[#allocation8 + $0x28] sm:$0xff] }
  0x22   :  { %116 = vmatpush.msra.mxu0 %v97_v12  ;;  %v175_v44 = vld [vmem:[#allocation8 + $0x20] sm:$0xff]  ;;  %v174_v45 = vld [vmem:[#allocation8 + $0x18] sm:$0xff]  ;;  %v173_v50 = vld [vmem:[#allocation8 + $0x10] sm:$0xff] }
  0x23   :  { %157 = vmatpush.msra.mxu1 %v138_v17  ;;  %193 = vmatpush.msra.mxu2 %v184_v35  ;;  %v238_v46 = vld [vmem:[%s442_s2] ss:$0 sm:$0xff]  ;;  %v172_v51 = vld [vmem:[#allocation8 + $0x8] sm:$0xff]  ;;  %v171_v52 = vld [vmem:[#allocation8] sm:$0xff] }
  0x24   :  { %117 = vmatpush.msra.mxu0 %v96_v14  ;;  %v239_v53 = vld [vmem:[%s444_s4] ss:$0 sm:$0xff] }
  0x25   :  { %158 = vmatpush.msra.mxu1 %v137_v19  ;;  %194 = vmatpush.msra.mxu2 %v183_v36  ;;  %v240_v57 = vld [vmem:[%s446_s6] ss:$0 sm:$0xff] }
  0x26   :  { %118 = vmatpush.msra.mxu0 %v95_v16 }
  0x27   :  { %159 = vmatpush.msra.mxu1 %v136_v21  ;;  %195 = vmatpush.msra.mxu2 %v182_v37 }
  0x28   :  { %119 = vmatpush.msra.mxu0 %v94_v18 }
  0x29   :  { %160 = vmatpush.msra.mxu1 %v135_v23  ;;  %196 = vmatpush.msra.mxu2 %v181_v38 }
  0x2a   :  { %120 = vmatpush.msra.mxu0 %v93_v20 }
  0x2b   :  { %161 = vmatpush.msra.mxu1 %v134_v25  ;;  %197 = vmatpush.msra.mxu2 %v180_v39 }
  0x2c   :  { %121 = vmatpush.msra.mxu0 %v92_v22 }
  0x2d   :  { %162 = vmatpush.msra.mxu1 %v133_v27  ;;  %198 = vmatpush.msra.mxu2 %v179_v40 }
  0x2e   :  { %122 = vmatpush.msra.mxu0 %v91_v24 }
  0x2f   :  { %163 = vmatpush.msra.mxu1 %v132_v30  ;;  %199 = vmatpush.msra.mxu2 %v178_v41 }
  0x30   :  { %123 = vmatpush.msra.mxu0 %v90_v26 }
  0x31   :  { %164 = vmatpush.msra.mxu1 %v131_v31  ;;  %200 = vmatpush.msra.mxu2 %v177_v42 }
  0x32   :  { %124 = vmatpush.msra.mxu0 %v89_v28 }
  0x33   :  { %125 = vmatmul.f32.vlgmr.msra.gmra.mxu0 %v88_v29  ;;  %165 = vmatpush.msra.mxu1 %v130_v32 }
  0x34   :  { %201 = vmatpush.msra.mxu2 %v176_v43 }
  0x36   :  { %202 = vmatpush.msra.mxu2 %v175_v44 }
  0x38   :  { %203 = vmatpush.msra.mxu2 %v174_v45 }
  0x3a   :  { %204 = vmatpush.msra.mxu2 %v173_v50 }
  0x3c   :  { %205 = vmatpush.msra.mxu2 %v172_v51 }
  0x3e   :  { %206 = vmatpush.msra.mxu2 %v171_v52 }
  0xb0   :  { %v126_v47 = vpop.f32.mrf.mxu0 }
  0xb1   :  { %v127_v48 = vadd.f32 %v238_v46, %v126_v47 }
  0xb3   :  { %v129_v49 = vmax.f32 %v127_v48, 0.0 }
  0xb5   :  { %166 = vmatmul.f32.vlgmr.msra.gmra.mxu1 %v129_v49 }
 0x132   :  { %v167_v54 = vpop.f32.mrf.mxu1 }
 0x133   :  { %v168_v55 = vadd.f32 %v239_v53, %v167_v54 }
 0x135   :  { %v170_v56 = vmax.f32 %v168_v55, 0.0 }
 0x137   :  { %207 = vmatmul.f32.vlgmr.msra.gmra.mxu2 %v170_v56 }
 0x1ba   :  { %v208_v58 = vpop.f32.mrf.mxu2 }
 0x1bb   :  { %v209_v59 = vadd.f32 %v240_v57, %v208_v58 }
 0x1bd   :  { %211 = vst [vmem:[#allocation10] sm:$0xff] %v209_v59 }
 0x1be   :  { %222 = dma.vmem_to_hbm [thread:$0]  %s218_s25, 128, %s220_s28, [#allocation4]  }
 0x1bf   :  { %367 = dma.done.wait [#allocation4], 128  }
 0x1c0   :  { %368 = vsyncadd [#allocation4], 4294967168 }
 0x1c1   :  { %227 = vsyncpa [#allocation3], 1 }
 0x1c2   :  { %228 = vsyncpa [#allocation6], 1 }
 0x1c3   :  { %229 = vsyncpa [#allocation9], 1 }
 0x1c4   :  { %230 = vsyncpa [#allocation4], 1 }

// kernel: _mlp_pallas.1
= control target key start
LH: loop header
LB: loop body
LE: loop exit
PB: predicated region body
PF: predicated region fallthrough
CT: control target
= control target key end

     0   :  { %12 = vsyncpa [#allocation3], 0  ;;  %s440_s0 = inlined_call_operand.hbm [shape: f32[8,128], index: 0, kind: input, shape index: {}]   ;;  %s441_s1 = inlined_call_operand.hbm [shape: f32[128,128], index: 1, kind: input, shape index: {}]   ;;  %s442_s2 = inlined_call_operand.vmem [shape: f32[1,128], index: 2, kind: input, shape index: {}]   ;;  %s443_s3 = inlined_call_operand.hbm [shape: f32[128,128], index: 3, kind: input, shape index: {}]   ;;  %s444_s4 = inlined_call_operand.vmem [shape: f32[1,128], index: 4, kind: input, shape index: {}]   ;;  %s445_s5 = inlined_call_operand.hbm [shape: f32[128,128], index: 5, kind: input, shape index: {}]   ;;  %s446_s6 = inlined_call_operand.vmem [shape: f32[1,128], index: 6, kind: input, shape index: {}]   ;;  %s447_s7 = inlined_call_operand.hbm [shape: f32[8,128], index: 7, kind: output, shape index: {}]  }
   0x1   :  { %13 = vsyncpa [#allocation6], 0 }
   0x2   :  { %14 = vsyncpa [#allocation9], 0  ;;  %s31_s26 = sshll.u32 %s441_s1, 4  ;;  %s32_s26 = int_to_ptr.hbm [resolvable:$true] %s31_s26 }
   0x3   :  { %15 = vsyncpa [#allocation4], 0  ;;  %s369_s27 = smov [#allocation5]   ;;  %s21_s8 = sshll.u32 %s440_s0, 4  ;;  %s22_s8 = int_to_ptr.hbm [resolvable:$true] %s21_s8 }
   0x4   :  { %s33_s28 = sshll.u32 %s369_s27, 4  ;;  %s370_s9 = smov 128   ;;  %s34_s28 = int_to_ptr.vmem [resolvable:$true] %s33_s28 }
   0x5   :  { %s371_s10 = smov 8   ;;  %s372_s11 = smov [#allocation2]  }
   0x6   :  { %39 = dma.hbm_to_vmem [thread:$0]  %s32_s26, 2048, %s34_s28, [#allocation6], %s370_s9, %s370_s9, %s371_s10  }
   0x7   :  { %s23_s12 = sshll.u32 %s372_s11, 4  ;;  %s46_s15 = sshll.u32 %s443_s3, 4  ;;  %s24_s12 = int_to_ptr.vmem [resolvable:$true] %s23_s12  ;;  %s47_s15 = int_to_ptr.hbm [resolvable:$true] %s46_s15 }
   0x8   :  { %26 = dma.hbm_to_vmem [thread:$0]  %s22_s8, 128, %s24_s12, [#allocation3]  }
   0x9   :  { %s61_s17 = sshll.u32 %s445_s5, 4  ;;  %s373_s18 = smov [#allocation7]   ;;  %s62_s17 = int_to_ptr.hbm [resolvable:$true] %s61_s17 }
   0xa   :  { %s48_s19 = sshll.u32 %s373_s18, 4  ;;  %s374_s0 = smov [#allocation8]   ;;  %s49_s19 = int_to_ptr.vmem [resolvable:$true] %s48_s19 }
   0xb   :  { %54 = dma.hbm_to_vmem [thread:$0]  %s47_s15, 2048, %s49_s19, [#allocation6], %s370_s9, %s370_s9, %s371_s10  }
   0xc   :  { %s63_s20 = sshll.u32 %s374_s0, 4  ;;  %s64_s20 = int_to_ptr.vmem [resolvable:$true] %s63_s20 }
   0xd   :  { %69 = dma.hbm_to_vmem [thread:$0]  %s62_s17, 2048, %s64_s20, [#allocation9], %s370_s9, %s370_s9, %s371_s10  }
   0xe   :  { %361 = dma.done.wait [#allocation3], 128  }
   0xf   :  { %362 = vsyncadd [#allocation3], 4294967168 }
  0x10   :  { %363 = dma.done.wait [#allocation6], 4096  }
  0x11   :  { %364 = vsyncadd [#allocation6], 4294963200 }
  0x12   :  { %365 = dma.done.wait [#allocation9], 2048  }
  0x13   :  { %366 = vsyncadd [#allocation9], 4294965248  ;;  %v104_v0 = vld [vmem:[#allocation5 + $0x78] sm:$0xff]  ;;  %v103_v1 = vld [vmem:[#allocation5 + $0x70] sm:$0xff]  ;;  %s375_s24 = smov [#allocation10]   ;;  %s219_s28 = sshll.u32 %s447_s7, 4  ;;  %s220_s28 = int_to_ptr.hbm [resolvable:$true] %s219_s28 }
  0x14   :  { %109 = vmatpush.msra.mxu0 %v104_v0  ;;  %v102_v2 = vld [vmem:[#allocation5 + $0x68] sm:$0xff]  ;;  %v101_v3 = vld [vmem:[#allocation5 + $0x60] sm:$0xff]  ;;  %v145_v4 = vld [vmem:[#allocation7 + $0x78] sm:$0xff]  ;;  %s217_s25 = sshll.u32 %s375_s24, 4  ;;  %s218_s25 = int_to_ptr.vmem [resolvable:$true] %s217_s25 }
  0x15   :  { %v100_v5 = vld [vmem:[#allocation5 + $0x58] sm:$0xff]  ;;  %150 = vmatpush.msra.mxu1 %v145_v4  ;;  %v144_v6 = vld [vmem:[#allocation7 + $0x70] sm:$0xff]  ;;  %v143_v7 = vld [vmem:[#allocation7 + $0x68] sm:$0xff] }
  0x16   :  { %110 = vmatpush.msra.mxu0 %v103_v1  ;;  %v99_v8 = vld [vmem:[#allocation5 + $0x50] sm:$0xff]  ;;  %v142_v9 = vld [vmem:[#allocation7 + $0x60] sm:$0xff]  ;;  %v98_v10 = vld [vmem:[#allocation5 + $0x48] sm:$0xff] }
  0x17   :  { %151 = vmatpush.msra.mxu1 %v144_v6  ;;  %v141_v11 = vld [vmem:[#allocation7 + $0x58] sm:$0xff]  ;;  %v97_v12 = vld [vmem:[#allocation5 + $0x40] sm:$0xff]  ;;  %v140_v13 = vld [vmem:[#allocation7 + $0x50] sm:$0xff] }
  0x18   :  { %111 = vmatpush.msra.mxu0 %v102_v2  ;;  %v96_v14 = vld [vmem:[#allocation5 + $0x38] sm:$0xff]  ;;  %v139_v15 = vld [vmem:[#allocation7 + $0x48] sm:$0xff]  ;;  %v95_v16 = vld [vmem:[#allocation5 + $0x30] sm:$0xff] }
  0x19   :  { %152 = vmatpush.msra.mxu1 %v143_v7  ;;  %v138_v17 = vld [vmem:[#allocation7 + $0x40] sm:$0xff]  ;;  %v94_v18 = vld [vmem:[#allocation5 + $0x28] sm:$0xff]  ;;  %v137_v19 = vld [vmem:[#allocation7 + $0x38] sm:$0xff] }
  0x1a   :  { %112 = vmatpush.msra.mxu0 %v101_v3  ;;  %v93_v20 = vld [vmem:[#allocation5 + $0x20] sm:$0xff]  ;;  %v136_v21 = vld [vmem:[#allocation7 + $0x30] sm:$0xff]  ;;  %v92_v22 = vld [vmem:[#allocation5 + $0x18] sm:$0xff] }
  0x1b   :  { %153 = vmatpush.msra.mxu1 %v142_v9  ;;  %v135_v23 = vld [vmem:[#allocation7 + $0x28] sm:$0xff]  ;;  %v91_v24 = vld [vmem:[#allocation5 + $0x10] sm:$0xff]  ;;  %v134_v25 = vld [vmem:[#allocation7 + $0x20] sm:$0xff] }
  0x1c   :  { %113 = vmatpush.msra.mxu0 %v100_v5  ;;  %v90_v26 = vld [vmem:[#allocation5 + $0x8] sm:$0xff]  ;;  %v133_v27 = vld [vmem:[#allocation7 + $0x18] sm:$0xff]  ;;  %v89_v28 = vld [vmem:[#allocation5] sm:$0xff] }
  0x1d   :  { %154 = vmatpush.msra.mxu1 %v141_v11  ;;  %v88_v29 = vld [vmem:[#allocation2] sm:$0xff]  ;;  %v132_v30 = vld [vmem:[#allocation7 + $0x10] sm:$0xff]  ;;  %v131_v31 = vld [vmem:[#allocation7 + $0x8] sm:$0xff] }
  0x1e   :  { %114 = vmatpush.msra.mxu0 %v99_v8  ;;  %v130_v32 = vld [vmem:[#allocation7] sm:$0xff]  ;;  %v186_v33 = vld [vmem:[#allocation8 + $0x78] sm:$0xff]  ;;  %v185_v34 = vld [vmem:[#allocation8 + $0x70] sm:$0xff] }
  0x1f   :  { %155 = vmatpush.msra.mxu1 %v140_v13  ;;  %191 = vmatpush.msra.mxu2 %v186_v33  ;;  %v184_v35 = vld [vmem:[#allocation8 + $0x68] sm:$0xff]  ;;  %v183_v36 = vld [vmem:[#allocation8 + $0x60] sm:$0xff]  ;;  %v182_v37 = vld [vmem:[#allocation8 + $0x58] sm:$0xff] }
  0x20   :  { %115 = vmatpush.msra.mxu0 %v98_v10  ;;  %v181_v38 = vld [vmem:[#allocation8 + $0x50] sm:$0xff]  ;;  %v180_v39 = vld [vmem:[#allocation8 + $0x48] sm:$0xff]  ;;  %v179_v40 = vld [vmem:[#allocation8 + $0x40] sm:$0xff] }
  0x21   :  { %156 = vmatpush.msra.mxu1 %v139_v15  ;;  %192 = vmatpush.msra.mxu2 %v185_v34  ;;  %v178_v41 = vld [vmem:[#allocation8 + $0x38] sm:$0xff]  ;;  %v177_v42 = vld [vmem:[#allocation8 + $0x30] sm:$0xff]  ;;  %v176_v43 = vld [vmem:[#allocation8 + $0x28] sm:$0xff] }
  0x22   :  { %116 = vmatpush.msra.mxu0 %v97_v12  ;;  %v175_v44 = vld [vmem:[#allocation8 + $0x20] sm:$0xff]  ;;  %v174_v45 = vld [vmem:[#allocation8 + $0x18] sm:$0xff]  ;;  %v173_v50 = vld [vmem:[#allocation8 + $0x10] sm:$0xff] }
  0x23   :  { %157 = vmatpush.msra.mxu1 %v138_v17  ;;  %193 = vmatpush.msra.mxu2 %v184_v35  ;;  %v238_v46 = vld [vmem:[%s442_s2] ss:$0 sm:$0xff]  ;;  %v172_v51 = vld [vmem:[#allocation8 + $0x8] sm:$0xff]  ;;  %v171_v52 = vld [vmem:[#allocation8] sm:$0xff] }
  0x24   :  { %117 = vmatpush.msra.mxu0 %v96_v14  ;;  %v239_v53 = vld [vmem:[%s444_s4] ss:$0 sm:$0xff] }
  0x25   :  { %158 = vmatpush.msra.mxu1 %v137_v19  ;;  %194 = vmatpush.msra.mxu2 %v183_v36  ;;  %v240_v57 = vld [vmem:[%s446_s6] ss:$0 sm:$0xff] }
  0x26   :  { %118 = vmatpush.msra.mxu0 %v95_v16 }
  0x27   :  { %159 = vmatpush.msra.mxu1 %v136_v21  ;;  %195 = vmatpush.msra.mxu2 %v182_v37 }
  0x28   :  { %119 = vmatpush.msra.mxu0 %v94_v18 }
  0x29   :  { %160 = vmatpush.msra.mxu1 %v135_v23  ;;  %196 = vmatpush.msra.mxu2 %v181_v38 }
  0x2a   :  { %120 = vmatpush.msra.mxu0 %v93_v20 }
  0x2b   :  { %161 = vmatpush.msra.mxu1 %v134_v25  ;;  %197 = vmatpush.msra.mxu2 %v180_v39 }
  0x2c   :  { %121 = vmatpush.msra.mxu0 %v92_v22 }
  0x2d   :  { %162 = vmatpush.msra.mxu1 %v133_v27  ;;  %198 = vmatpush.msra.mxu2 %v179_v40 }
  0x2e   :  { %122 = vmatpush.msra.mxu0 %v91_v24 }
  0x2f   :  { %163 = vmatpush.msra.mxu1 %v132_v30  ;;  %199 = vmatpush.msra.mxu2 %v178_v41 }
  0x30   :  { %123 = vmatpush.msra.mxu0 %v90_v26 }
  0x31   :  { %164 = vmatpush.msra.mxu1 %v131_v31  ;;  %200 = vmatpush.msra.mxu2 %v177_v42 }
  0x32   :  { %124 = vmatpush.msra.mxu0 %v89_v28 }
  0x33   :  { %125 = vmatmul.f32.vlgmr.msra.gmra.mxu0 %v88_v29  ;;  %165 = vmatpush.msra.mxu1 %v130_v32 }
  0x34   :  { %201 = vmatpush.msra.mxu2 %v176_v43 }
  0x36   :  { %202 = vmatpush.msra.mxu2 %v175_v44 }
  0x38   :  { %203 = vmatpush.msra.mxu2 %v174_v45 }
  0x3a   :  { %204 = vmatpush.msra.mxu2 %v173_v50 }
  0x3c   :  { %205 = vmatpush.msra.mxu2 %v172_v51 }
  0x3e   :  { %206 = vmatpush.msra.mxu2 %v171_v52 }
  0xb0   :  { %v126_v47 = vpop.f32.mrf.mxu0 }
  0xb1   :  { %v127_v48 = vadd.f32 %v238_v46, %v126_v47 }
  0xb3   :  { %v129_v49 = vmax.f32 %v127_v48, 0.0 }
  0xb5   :  { %166 = vmatmul.f32.vlgmr.msra.gmra.mxu1 %v129_v49 }
 0x132   :  { %v167_v54 = vpop.f32.mrf.mxu1 }
 0x133   :  { %v168_v55 = vadd.f32 %v239_v53, %v167_v54 }
 0x135   :  { %v170_v56 = vmax.f32 %v168_v55, 0.0 }
 0x137   :  { %207 = vmatmul.f32.vlgmr.msra.gmra.mxu2 %v170_v56 }
 0x1ba   :  { %v208_v58 = vpop.f32.mrf.mxu2 }
 0x1bb   :  { %v209_v59 = vadd.f32 %v240_v57, %v208_v58 }
 0x1bd   :  { %211 = vst [vmem:[#allocation10] sm:$0xff] %v209_v59 }
 0x1be   :  { %222 = dma.vmem_to_hbm [thread:$0]  %s218_s25, 128, %s220_s28, [#allocation4]  }
 0x1bf   :  { %367 = dma.done.wait [#allocation4], 128  }
 0x1c0   :  { %368 = vsyncadd [#allocation4], 4294967168 }
 0x1c1   :  { %227 = vsyncpa [#allocation3], 1 }
 0x1c2   :  { %228 = vsyncpa [#allocation6], 1 }
 0x1c3   :  { %229 = vsyncpa [#allocation9], 1 }
 0x1c4   :  { %230 = vsyncpa [#allocation4], 1 }

</bundles_post_ra>
